<compile_context>
chip_gen: v7x
topology: tpu7x:2x2x1
jax: 0.10.0
libtpu: 0.0.40
codegen_flags: <defaults>
</compile_context>

<pallas_src>
import functools

import jax
import jax.numpy as jnp
from jax.experimental import pallas as pl
from jax.experimental.pallas import tpu as pltpu


def _linear_relu_kernel(x_ref, p_ref, o_ref, *, in_features):
    # x_ref: (B, IN)      f32
    # p_ref: (IN+1, OUT)  f32   rows [0:IN]  = W^T  (IN, OUT)
    #                           row  [IN]    = bias (1, OUT)
    # o_ref: (B, OUT)     f32
    w = p_ref[:in_features, :]                     # (IN, OUT)  static, tile-aligned
    b = p_ref[in_features:in_features + 1, :]      # (1, OUT)   static, tile-aligned
    y = jnp.dot(x_ref[...], w, preferred_element_type=jnp.float32)
    o_ref[...] = jnp.maximum(y + b, 0.0).astype(o_ref.dtype)


def prepare_params(weight, bias):
    """One-time parameter prep (hoisted out of the per-call path).

    weight: (OUT, IN) f32 (PyTorch nn.Linear layout)
    bias:   (OUT,)    f32
    Returns a single packed (IN+1, OUT) f32 buffer: [W^T; b].
    """
    return jnp.concatenate([weight.T, bias.reshape(1, -1)], axis=0)


@jax.jit
def linear_relu(x, packed):
    """x: (B, IN) f32; packed: (IN+1, OUT) f32 from prepare_params."""
    B, in_features = x.shape
    out_features = packed.shape[1]
    kernel = functools.partial(_linear_relu_kernel, in_features=in_features)
    return pl.pallas_call(
        kernel,
        out_shape=jax.ShapeDtypeStruct((B, out_features), x.dtype),
        # Whole arrays as single blocks (tiny shapes); everything in VMEM.
        in_specs=[
            pl.BlockSpec(memory_space=pltpu.MemorySpace.VMEM),
            pl.BlockSpec(memory_space=pltpu.MemorySpace.VMEM),
        ],
        out_specs=pl.BlockSpec(memory_space=pltpu.MemorySpace.VMEM),
    )(x, packed)


if __name__ == "__main__":
    key = jax.random.PRNGKey(0)
    k_x, k_w, k_b = jax.random.split(key, 3)

    B, IN, OUT = 1, 64, 8

    # Deterministic parameter init (mimicking nn.Linear's uniform init range).
    bound = 1.0 / (IN ** 0.5)
    weight = jax.random.uniform(k_w, (OUT, IN), jnp.float32, -bound, bound)
    bias = jax.random.uniform(k_b, (OUT,), jnp.float32, -bound, bound)

    x2 = jax.random.normal(k_x, (B, IN), jnp.float32)

    # One-time parameter prep, outside the call path.
    packed = prepare_params(weight, bias)
    packed = jax.block_until_ready(packed)

    out = linear_relu(x2, packed)
    out = jax.block_until_ready(out)

    # Reference check in plain JAX (PyTorch semantics: relu(x @ W^T + b)).
    ref = jnp.maximum(x2 @ weight.T + bias, 0.0)
    assert out.shape == (B, OUT)
    assert jnp.allclose(out, ref, atol=1e-5, rtol=1e-5)

    print("KERNEL_OK")
</pallas_src>

<mosaic_0001>
module attributes {stable_mosaic.version = 11 : i64} {
  func.func @_linear_relu_kernel(%arg0: memref<1x64xf32, #tpu.memory_space<vmem>>, %arg1: memref<65x8xf32, #tpu.memory_space<vmem>>, %arg2: memref<1x8xf32, #tpu.memory_space<vmem>>) attributes {dimension_semantics = [], scalar_prefetch = 0 : i64, scratch_operands = 0 : i64, tpu.core_type = #tpu.core_type<tc>} {
    %c0 = arith.constant 0 : index
    %c0_0 = arith.constant 0 : index
    %0 = vector.load %arg1[%c0, %c0_0] : memref<65x8xf32, #tpu.memory_space<vmem>>, vector<64x8xf32>
    %c64 = arith.constant 64 : index
    %c0_1 = arith.constant 0 : index
    %1 = vector.load %arg1[%c64, %c0_1] : memref<65x8xf32, #tpu.memory_space<vmem>>, vector<1x8xf32>
    %c0_2 = arith.constant 0 : index
    %c0_3 = arith.constant 0 : index
    %2 = vector.load %arg0[%c0_2, %c0_3] : memref<1x64xf32, #tpu.memory_space<vmem>>, vector<1x64xf32>
    %cst = arith.constant dense<0.000000e+00> : vector<1x8xf32>
    %3 = tpu.matmul %2, %0, %cst {dimension_numbers = #tpu.dot_dimension_numbers<[1], [0], [0], [1], [0, 0, 1, 1], [], []>} : vector<1x64xf32>, vector<64x8xf32>, vector<1x8xf32> -> vector<1x8xf32>
    %4 = arith.addf %3, %1 : vector<1x8xf32>
    %cst_4 = arith.constant 0.000000e+00 : f32
    %5 = vector.broadcast %cst_4 : f32 to vector<1x8xf32>
    %6 = arith.maximumf %4, %5 : vector<1x8xf32>
    %c0_5 = arith.constant 0 : index
    %c0_6 = arith.constant 0 : index
    %7 = vector.load %arg2[%c0_5, %c0_6] : memref<1x8xf32, #tpu.memory_space<vmem>>, vector<1x8xf32>
    tpu.vector_store %arg2[%c0_5, %c0_6], %6 {strides = array<i32>} : memref<1x8xf32, #tpu.memory_space<vmem>>, vector<1x8xf32>,
    return
  }
}

</mosaic_0001>

<bundles_post_ra>
// kernel: linear_relu.1
= control target key start
LH: loop header
LB: loop body
LE: loop exit
PB: predicated region body
PF: predicated region fallthrough
CT: control target
= control target key end

     0   :  { %v182_v3 = vmov 0.0|0.0   ;;  %vm183_vm0 = vmmov 0   ;;  %v184_v6 = vmov 0.0   ;;  %s243_s0 = inlined_call_operand.vmem [shape: f32[1,64], index: 0, kind: input, shape index: {}]   ;;  %s244_s1 = inlined_call_operand.vmem [shape: f32[65,8], index: 1, kind: input, shape index: {}]   ;;  %s245_s2 = inlined_call_operand.hbm [shape: f32[1,8], index: 2, kind: output, shape index: {}]  }
   0x1   :  { %v12_v0 = vld [vmem:[%s244_s1] sm:$0xff]  ;;  %v13_v1 = vld [vmem:[%s244_s1 + $0x8] sm:$0xff]  ;;  %v14_v2 = vld [vmem:[%s244_s1 + $0x10] sm:$0xff]  ;;  %142 = vmatprep.subr.bf16.mxu0 %v182_v3  ;;  %139 = vmatprep.mubr.msk.f32.mxu0 %vm183_vm0, %v184_v6 }
   0x2   :  { %v143_v4 = vpack.c.bf16 %v13_v1, %v12_v0  ;;  %v15_v5 = vld [vmem:[%s244_s1 + $0x18] sm:$0xff] }
   0x3   :  { %v146_v7 = vpack.c.bf16 %v15_v5, %v14_v2 }
   0x4   :  { %144 = vmatpush3.bf16.msra.mxu0 %v143_v4 }
   0x5   :  { %7 = vsyncpa [#allocation3], 0  ;;  %145 = vmatprep.subr.bf16.mxu0 %v182_v3  ;;  %v16_v8 = vld [vmem:[%s244_s1 + $0x20] sm:$0xff]  ;;  %v17_v9 = vld [vmem:[%s244_s1 + $0x28] sm:$0xff]  ;;  %vm22_vm1 = vcmask 523264   ;;  %s185_s29 = smov [#allocation2]  }
   0x6   :  { %v149_v10 = vpack.c.bf16 %v17_v9, %v16_v8  ;;  %v18_v11 = vld [vmem:[%s244_s1 + $0x30] sm:$0xff]  ;;  %v19_v12 = vld [vmem:[%s244_s1 + $0x38] sm:$0xff]  ;;  %v21_v14 = vld [vmem:[%s243_s0] sm:$0x1]  ;;  %s105_s30 = sshll.u32 %s185_s29, 4  ;;  %vm97_vm2 = vcmask 57344   ;;  %s106_s30 = int_to_ptr.vmem [resolvable:$true] %s105_s30 }
   0x7   :  { %v152_v13 = vpack.c.bf16 %v19_v12, %v18_v11  ;;  %v20_v15 = vld [vmem:[%s244_s1 + $0x40] sm:$0x1]  ;;  %s158_s3 = scalar_lea.vmem %s106_s30, 16  ;;  %s162_s4 = scalar_lea.vmem %s106_s30, 32 }
   0x8   :  { %147 = vmatpush3.bf16.msra.mxu0 %v146_v7  ;;  %p159_p0 = scmp.ne.s32.totalorder %s106_s30, %s158_s3  ;;  %p163_p1 = scmp.lt.s32.totalorder %s106_s30, %s106_s30 }
   0x9   :  { %148 = vmatprep.subr.bf16.mxu0 %v182_v3  ;;  %p164_p2 = scmp.lt.s32.totalorder %s162_s4, %s158_s3 }
   0xb   :  { %p165_p3 = por %p164_p2, %p163_p1 }
   0xc   :  { %150 = vmatpush3.bf16.msra.mxu0 %v149_v10 }
   0xd   :  { %151 = vmatprep.subr.bf16.mxu0 %v182_v3  ;;  %p166_p4 = pnand %p165_p3, %p159_p0 }
  0x10   :  { %153 = vmatpush3.bf16.msra.mxu0 %v152_v13 }
  0x13   :  { %140 = vmatmul.mubr.msk.f32.vlgmr.msra.gmra.mrb[0].mxu0 %vm22_vm1, %v21_v14 }
  0xe6   :  { %v92_v16 = vpop.f32.mrb[0].mxu0 }
  0xe7   :  { %v93_v17 = vadd.f32 %v92_v16, %v20_v15  ;;  %v141_v18 = vpop.f32.mrb[1].mxu0 }
  0xe9   :  { %v96_v19 = vmax.f32 %v93_v17, 0.0 }
  0xeb   :  { %98 = vst.msk [vmem:[#allocation2] sm:$0x1] %vm97_vm2, %v96_v19 }
  0xec   :  { %169 = shalt.err (!%p166_p4)
}
  0xed   :  { %s170_s1 = scalar_lea.hbm %s245_s2, 16 }
  0xee   :  { %p171_p5 = scmp.ne.s32.totalorder %s245_s2, %s170_s1  ;;  %p174_p6 = scmp.lt.u32.totalorder %s170_s1, %s245_s2 }
  0xf0   :  { %p176_p7 = pnand %p174_p6, %p171_p5 }
  0xf2   :  { %179 = shalt.err (!%p176_p7)
}
  0xf3   :  { %108 = dma.vmem_to_hbm [thread:$0]  %s106_s30, 16, %s245_s2, [#allocation3]  }
  0xf4   :  { %180 = dma.done.wait [#allocation3], 16  }
  0xf5   :  { %181 = vsyncadd [#allocation3], 4294967280 }
  0xf6   :  { %112 = vsyncpa [#allocation3], 1 }

</bundles_post_ra>
